<compile_context>
chip_gen: v7x
topology: tpu7x:2x2x1
jax: 0.10.0
libtpu: 0.0.40
codegen_flags: <defaults>
</compile_context>

<pallas_src>
import math

import jax
import jax.numpy as jnp
from jax import lax
from jax.experimental import pallas as pl
from jax.experimental.pallas import tpu as pltpu

_INV_SQRT2 = 1.0 / math.sqrt(2.0)
_SQRT_2_OVER_PI = math.sqrt(2.0 / math.pi)


def _round_up(v, m):
    return (v + m - 1) // m * m


def _make_downscale_kernel(approximate_gelu):
    def kernel(x_ref, w_ref, b_ref, o_ref):
        # x_ref: (Cin, TS)   spatial tile of one batch element (lanes = spatial)
        # w_ref: (Cout, Cin) 1x1-conv weight with BN scale folded in (f32)
        # b_ref: (Cout, 1)   folded BN bias = beta - mean * gamma / sqrt(var+eps)
        # o_ref: (Cout, TS)  lane-dense output tile
        x = x_ref[...]
        if x.dtype != w_ref.dtype:
            x = x.astype(w_ref.dtype)
        y = jnp.dot(w_ref[...], x, preferred_element_type=jnp.float32)
        y = y + b_ref[...]
        if approximate_gelu:
            # tanh GELU: transcendental goes to the EUP slot (free wrt VALU).
            inner = _SQRT_2_OVER_PI * (y + 0.044715 * (y * y * y))
            y = 0.5 * y * (1.0 + jnp.tanh(inner))
        else:
            # exact erf GELU, matching torch F.gelu default (approximate='none')
            y = 0.5 * y * (1.0 + lax.erf(y * _INV_SQRT2))
        o_ref[...] = y.astype(o_ref.dtype)

    return kernel


def _vmem_limit_bytes():
    # Per-generation VMEM: v5e/v6e have 128 MiB physical, v7x only 64 MiB
    # (shared with compiler scratch).  Leave ~40% headroom on every chip.
    try:
        capacity = int(pltpu.get_tpu_info().vmem_capacity_bytes)
    except Exception:  # pragma: no cover - conservative fallback (v7x-sized)
        capacity = 64 * 1024 * 1024
    limit = min(int(capacity * 0.6), 64 * 1024 * 1024)
    return max(limit, 32 * 1024 * 1024)


def downscale_filters(x_nchw, weight, gamma, beta, running_mean, running_var,
                      eps=1e-5, out_dtype=None, approximate_gelu=False):
    N, Cin, H, W = x_nchw.shape
    Cout = weight.shape[0]
    HW = H * W
    out_dtype = jnp.dtype(x_nchw.dtype if out_dtype is None else out_dtype)

    # NCHW kept as-is; merging H,W is a free (contiguous) reshape, no transpose.
    x3 = x_nchw.reshape(N, Cin, HW)

    # Fold eval-mode BN into the conv weight and a per-channel bias (f32).
    inv_std = lax.rsqrt(running_var.astype(jnp.float32) + eps)
    scale = gamma.astype(jnp.float32) * inv_std                        # (Cout,)
    w_folded = weight.reshape(Cout, Cin).astype(jnp.float32) * scale[:, None]
    bias = (beta.astype(jnp.float32)
            - running_mean.astype(jnp.float32) * scale).reshape(Cout, 1)

    # --- VMEM-aware spatial tiling -----------------------------------------
    vmem_limit = _vmem_limit_bytes()
    tile_budget = vmem_limit // 2            # headroom for weight/bias & misc

    in_itemsize = jnp.dtype(x_nchw.dtype).itemsize
    out_itemsize = out_dtype.itemsize
    # Sublane padding: the second-to-last tile dim pads to 32 B worth of rows
    # (8 rows f32, 16 rows bf16), so tiny Cin/Cout still cost 32 B/lane each.
    in_rows = _round_up(Cin, max(1, 32 // in_itemsize))
    out_rows = _round_up(Cout, max(1, 32 // out_itemsize))
    # Double-buffered input + output tiles, per spatial position.
    bytes_per_spatial = 2 * (in_rows * in_itemsize + out_rows * out_itemsize)

    max_ts = max(128, tile_budget // bytes_per_spatial)
    if HW <= max_ts:
        ts = HW                               # full dim is always a legal block
    else:
        ts = max(128, (max_ts // 128) * 128)  # lane-aligned big tile

    n_tiles = pl.cdiv(HW, ts)
    # Make sure at least 2 grid steps exist along the parallel axes so both
    # v7x TensorCores get work (no effect on v5e/v6e single-TC chips).
    if N * n_tiles < 2 and HW >= 256:
        ts = _round_up(-(-HW // 2), 128)
        n_tiles = pl.cdiv(HW, ts)

    grid = (N, n_tiles)

    out3 = pl.pallas_call(
        _make_downscale_kernel(approximate_gelu),
        out_shape=jax.ShapeDtypeStruct((N, Cout, HW), out_dtype),
        grid_spec=pltpu.PrefetchScalarGridSpec(
            num_scalar_prefetch=0,
            grid=grid,
            in_specs=[
                # NOTE: if profiling ever shows exposed DMA on ragged tiles,
                # add pipeline_mode=pl.Buffered(3) here (costs VMEM; matters
                # most on v7x, so only after confirming exposed DMA).
                pl.BlockSpec((None, Cin, ts), lambda n, s: (n, 0, s)),
                pl.BlockSpec((Cout, Cin), lambda n, s: (0, 0)),
                pl.BlockSpec((Cout, 1), lambda n, s: (0, 0)),
            ],
            out_specs=pl.BlockSpec((None, Cout, ts), lambda n, s: (n, 0, s)),
        ),
        compiler_params=pltpu.CompilerParams(
            dimension_semantics=("parallel", "parallel"),
            vmem_limit_bytes=vmem_limit,
        ),
    )(x3, w_folded, bias)

    # Free reshape back to NCHW (no transpose).
    return out3.reshape(N, Cout, H, W)


def _reference(x_nchw, weight, gamma, beta, running_mean, running_var, eps=1e-5):
    # pure-JAX reference: 1x1 conv + eval-mode BN + exact GELU, NCHW layout
    y = jnp.einsum("nchw,oc->nohw", x_nchw, weight.reshape(weight.shape[0], -1))
    s = gamma / jnp.sqrt(running_var + eps)
    b = beta - running_mean * s
    y = y * s[None, :, None, None] + b[None, :, None, None]
    return 0.5 * y * (1.0 + lax.erf(y / math.sqrt(2.0)))


if __name__ == "__main__":
    in_channels, out_channels = 4, 8
    N, H, W = 2, 16, 16

    key = jax.random.PRNGKey(0)
    kx, kw, kg, kb, km, kv = jax.random.split(key, 6)

    x = jax.random.normal(kx, (N, in_channels, H, W), dtype=jnp.float32)
    # Conv2d(kernel_size=1, bias=False) weight: (Cout, Cin, 1, 1)
    weight = jax.random.normal(kw, (out_channels, in_channels, 1, 1),
                               dtype=jnp.float32) * 0.5
    # BatchNorm2d parameters / running stats (deterministic, non-trivial)
    gamma = 1.0 + 0.1 * jax.random.normal(kg, (out_channels,), dtype=jnp.float32)
    beta = 0.1 * jax.random.normal(kb, (out_channels,), dtype=jnp.float32)
    running_mean = 0.2 * jax.random.normal(km, (out_channels,), dtype=jnp.float32)
    running_var = jnp.abs(jax.random.normal(kv, (out_channels,),
                                            dtype=jnp.float32)) + 0.5

    ref = _reference(x, weight, gamma, beta, running_mean, running_var)

    # Default path: exact erf GELU, f32 out -> matches the torch module.
    out = downscale_filters(x, weight, gamma, beta, running_mean, running_var)
    out = jax.block_until_ready(out)
    assert out.shape == (N, out_channels, H, W)
    assert jnp.allclose(out, ref, atol=1e-5, rtol=1e-5), "mismatch vs reference"

    # Fast path: tanh GELU (EUP) + bf16 output -- opt-in, does not bit-match
    # torch's default GELU, so it is checked only loosely here.
    out_fast = downscale_filters(x, weight, gamma, beta, running_mean,
                                 running_var, out_dtype=jnp.bfloat16,
                                 approximate_gelu=True)
    out_fast = jax.block_until_ready(out_fast)
    assert out_fast.dtype == jnp.bfloat16
    assert jnp.allclose(out_fast.astype(jnp.float32), ref, atol=5e-2, rtol=5e-2)

    print("KERNEL_OK")
</pallas_src>

<mosaic_0001>
module attributes {stable_mosaic.version = 11 : i64} {
  func.func @kernel(%arg0: i32, %arg1: i32, %arg2: memref<1x4x256xf32, #tpu.memory_space<vmem>>, %arg3: memref<8x4xf32, #tpu.memory_space<vmem>>, %arg4: memref<8x1xf32, #tpu.memory_space<vmem>>, %arg5: memref<1x8x256xf32, #tpu.memory_space<vmem>>) attributes {dimension_semantics = [#tpu.dimension_semantics<parallel>, #tpu.dimension_semantics<parallel>], iteration_bounds = array<i64: 2, 1>, scalar_prefetch = 0 : i64, scratch_operands = 0 : i64, tpu.core_type = #tpu.core_type<tc>, window_params = [{transform_indices = @transform_0, window_bounds = array<i64: 1, 4, 256>}, {pipeline_mode = #tpu.pipeline_mode<synchronous>, transform_indices = @transform_1, window_bounds = array<i64: 8, 4>}, {pipeline_mode = #tpu.pipeline_mode<synchronous>, transform_indices = @transform_2, window_bounds = array<i64: 8, 1>}, {transform_indices = @transform_3, window_bounds = array<i64: 1, 8, 256>}]} {
    %c0 = arith.constant 0 : index
    %c0_0 = arith.constant 0 : index
    %c0_1 = arith.constant 0 : index
    %0 = vector.load %arg2[%c0, %c0_0, %c0_1] : memref<1x4x256xf32, #tpu.memory_space<vmem>>, vector<1x4x256xf32>
    %1 = vector.shape_cast %0 : vector<1x4x256xf32> to vector<4x256xf32>
    %c0_2 = arith.constant 0 : index
    %c0_3 = arith.constant 0 : index
    %2 = vector.load %arg3[%c0_2, %c0_3] : memref<8x4xf32, #tpu.memory_space<vmem>>, vector<8x4xf32>
    %cst = arith.constant dense<0.000000e+00> : vector<8x256xf32>
    %3 = tpu.matmul %2, %1, %cst {dimension_numbers = #tpu.dot_dimension_numbers<[1], [0], [0], [1], [0, 0, 1, 1], [], []>} : vector<8x4xf32>, vector<4x256xf32>, vector<8x256xf32> -> vector<8x256xf32>
    %c0_4 = arith.constant 0 : index
    %c0_5 = arith.constant 0 : index
    %4 = vector.load %arg4[%c0_4, %c0_5] : memref<8x1xf32, #tpu.memory_space<vmem>>, vector<8x1xf32>
    %5 = vector.broadcast %4 : vector<8x1xf32> to vector<8x256xf32>
    %6 = arith.addf %3, %5 : vector<8x256xf32>
    %cst_6 = arith.constant 5.000000e-01 : f32
    %7 = vector.broadcast %cst_6 : f32 to vector<8x256xf32>
    %8 = arith.mulf %7, %6 : vector<8x256xf32>
    %cst_7 = arith.constant 0.707106769 : f32
    %9 = vector.broadcast %cst_7 : f32 to vector<8x256xf32>
    %10 = arith.mulf %6, %9 : vector<8x256xf32>
    %11 = math.erf %10 : vector<8x256xf32>
    %cst_8 = arith.constant 1.000000e+00 : f32
    %12 = vector.broadcast %cst_8 : f32 to vector<8x256xf32>
    %13 = arith.addf %12, %11 : vector<8x256xf32>
    %14 = arith.mulf %8, %13 : vector<8x256xf32>
    %c0_9 = arith.constant 0 : index
    %c0_10 = arith.constant 0 : index
    %c0_11 = arith.constant 0 : index
    %15 = vector.load %arg5[%c0_9, %c0_10, %c0_11] : memref<1x8x256xf32, #tpu.memory_space<vmem>>, vector<1x8x256xf32>
    %16 = vector.shape_cast %15 : vector<1x8x256xf32> to vector<8x256xf32>
    %17 = vector.shape_cast %14 : vector<8x256xf32> to vector<1x8x256xf32>
    tpu.vector_store %arg5[%c0_9, %c0_10, %c0_11], %17 {strides = array<i32>} : memref<1x8x256xf32, #tpu.memory_space<vmem>>, vector<1x8x256xf32>,
    return
  }
  func.func @transform_0(%arg0: i32, %arg1: i32) -> (i32, i32, i32) {
    %c0_i32 = arith.constant 0 : i32
    %c0_i32_0 = arith.constant 0 : i32
    return %arg0, %c0_i32, %arg1 : i32, i32, i32
  }
  func.func @transform_1(%arg0: i32, %arg1: i32) -> (i32, i32) {
    %c0_i32 = arith.constant 0 : i32
    %c0_i32_0 = arith.constant 0 : i32
    %c0_i32_1 = arith.constant 0 : i32
    return %c0_i32, %c0_i32_0 : i32, i32
  }
  func.func @transform_2(%arg0: i32, %arg1: i32) -> (i32, i32) {
    %c0_i32 = arith.constant 0 : i32
    %c0_i32_0 = arith.constant 0 : i32
    %c0_i32_1 = arith.constant 0 : i32
    return %c0_i32, %c0_i32_0 : i32, i32
  }
  func.func @transform_3(%arg0: i32, %arg1: i32) -> (i32, i32, i32) {
    %c0_i32 = arith.constant 0 : i32
    %c0_i32_0 = arith.constant 0 : i32
    return %arg0, %c0_i32, %arg1 : i32, i32, i32
  }
}

</mosaic_0001>

<bundles_post_ra>
// kernel: tpu_custom_call.1
= control target key start
LH: loop header
LB: loop body
LE: loop exit
PB: predicated region body
PF: predicated region fallthrough
CT: control target
= control target key end

     0   :  { %8 = vsyncpa [#allocation3], 0  ;;  %s697_s0 = inlined_call_operand.vmem [shape: f32[2,4,256], index: 0, kind: input, shape index: {}]   ;;  %s698_s1 = inlined_call_operand.vmem [shape: f32[8,4], index: 1, kind: input, shape index: {}]   ;;  %s699_s2 = inlined_call_operand.vmem [shape: f32[8,1], index: 2, kind: input, shape index: {}]   ;;  %s700_s3 = inlined_call_operand.hbm [shape: f32[2,8,256], index: 3, kind: output, shape index: {}]  }
   0x1   :  { %10 = vsyncpa [#allocation3 + $0x1], 0  ;;  %s579_s12 = smov 0   ;;  %s581_s13 = smov 0  }
   0x2   :  { %s583_s14 = smov 0   ;;  %s585_s15 = smov 0  }
   0x3   :  { %s587_s16 = smov 0   ;;  %s589_s17 = smov 0  }
   0x4 LB: > { %s395_s18 = sadd.s32 4294967295, %s554_s17   ;;  %s396_s19 = sadd.s32 4294967294, %s554_s17   ;;  %s554_s17 = sphi %s589_s17, %s16_s17   ;;  %s550_s16 = sphi %s587_s16, %s707_s16   ;;  %s546_s15 = sphi %s585_s15, %s706_s15   ;;  %s542_s14 = sphi %s583_s14, %s705_s14   ;;  %s538_s13 = sphi %s581_s13, %s704_s13   ;;  %s534_s12 = sphi %s579_s12, %s703_s12  }
   0x5   : > { %s28_s20 = sadd.s32 1, %s550_s16  ;;  %s107_s21 = sadd.s32 1, %s542_s14 }
   0x6   : > { %p30_p0 = scmp.ge.s32.totalorder %s28_s20, 2  ;;  %p117_p1 = scmp.ne.s32.totalorder %s542_s14, %s538_s13 }
   0x7   : > { %p118_p2 = scmp.eq.s32.totalorder %s395_s18, 1  ;;  %p123_p3 = scmp.ne.s32.totalorder %s538_s13, %s534_s12 }
   0x8   : > { %s709_s20 = smov (%p30_p0, %s28_s20), 0  ;;  %p124_p5 = scmp.eq.s32.totalorder %s396_s19, 1 }
   0x9   : > { %p619_p4 = por %p118_p2, %p117_p1  ;;  %s102_s23 = ssub.s32 %s550_s16, %s709_s20 }
   0xa   : > { %p399_p6 = scmp.ge.s32.totalorder %s554_s17, 1  ;;  %p105_p7 = scmp.eq.s32.totalorder %s102_s23, 0 }
   0xb   : > { %p626_p8 = por %p124_p5, %p123_p3  ;;  %p161_p9 = scmp.lt.s32.totalorder %s554_s17, 3 }
   0xc   : > { %s632_s25 = scalar_select %p105_p7, %s542_s14, %s107_s21  }
   0xd   : > { %p162_p10 = pnand %p399_p6, %p161_p9 }
   0xe   : > { %p190_p11 = scmp.lt.s32.totalorder (!%p162_p10), %s546_s15, 1  ;;  %v556_v0 = vmov (!%p162_p10), 0.0   ;;  %v557_v1 = vmov (!%p162_p10), 0   ;;  %v202_v2 = vld [vmem:[%s699_s2] sm:$0xff] (!%p162_p10)  ;;  %vm214_vm0 = vcmask (!%p162_p10), 1043456   ;;  %vm210_vm1 = vcmask (!%p162_p10), 31744  }
   0xf   : > { %165 = sbr.rel (%p162_p10) target bundleno = 277 (0x115), region = 32  ;;  %283 = vmatprep.mubr.f32.mxu0 (!%p162_p10), %v556_v0  ;;  %470 = vset.pattern.permute.xlu0 (!%p162_p10), %v557_v1  ;;  %v201_v5 = vld [vmem:[%s698_s1] sm:$0xff] (!%p162_p10)  ;;  %s186_s8 = sand.u32 (!%p162_p10), 1, %s538_s13  }
  0x10   : > { %205 = vperm.xlu0 (!%p162_p10), %470, %v202_v2   ;;  %s400_s9 = sshll.u32 (!%p162_p10), %s186_s8, 4  ;;  %s412_s10 = sshll.u32 (!%p162_p10), %s546_s15, 8 }
  0x11   : > { %s188_s11 = scalar_lea.vmem (!%p162_p10), [#allocation2], %s400_s9  ;;  %s650_s23 = scalar_lea.hbm (!%p162_p10), %s700_s3, %s412_s10 }
  0x12   : > { %s319_s18 = sshll.u32 (!%p162_p10), %s188_s11, 4  ;;  %s303_s26 = scalar_lea.sflag (!%p162_p10), [#allocation3], %s186_s8  ;;  %s652_s18 = int_to_ptr.vmem [resolvable:$true] %s319_s18 }
  0x13   : > { %s558_s27 = smov (!%p162_p10), [#allocation2]  }
  0x16   : > { %s191_s28 = scalar_select %p190_p11, %s546_s15, 1 }
  0x17   : > { %s476_s15 = scalar_lea.vmem %s652_s18, 256 }
  0x18   : > { %s411_s29 = sshll.u32 %s191_s28, 3  ;;  %p477_p12 = scmp.ne.s32.totalorder %s652_s18, %s476_s15 }
  0x19   : > { %s197_s5 = scalar_lea.vmem %s697_s0, %s411_s29  ;;  %s480_s28 = sshll.u32 %s558_s27, 4  ;;  %s481_s28 = int_to_ptr.vmem [resolvable:$false] %s480_s28 }
  0x1a   : > { %v200_v3 = vld [vmem:[%s197_s5] sm:$0xff]  ;;  %p478_p13 = pnand %p477_p12, %p619_p4  ;;  %s482_s29 = scalar_lea.vmem %s481_s28, 512 }
  0x1b   : > { %v209_v4 = vcombine.high %v200_v3, %v200_v3  ;;  %p483_p1 = scmp.lt.s32.totalorder %s652_s18, %s481_s28  ;;  %p484_p2 = scmp.lt.s32.totalorder %s482_s29, %s476_s15 }
  0x1c   : > { %p479_p0 = pneg %p478_p13 }
  0x1d   : > { %403 = vmatprep.subr.msk.mxu0 %vm214_vm0, %v209_v4  ;;  %p485_p3 = por %p484_p2, %p483_p1 }
  0x1e   : > { %404 = vmatpush1.msk.msra.mxu0 %vm214_vm0, %v200_v3 }
  0x1f   : > { %405 = vmatmul.mubr.msk.f32.vlgmr.msra.gmra.mrb[0].mxu0 %vm210_vm1, %v201_v5  ;;  %p486_p5 = pnand %p485_p3, %p479_p0 }
  0x8f   : > { %v206_v6 = vpop.permute.xlu0 %205 }
  0xf2   : > { %v285_v7 = vpop.f32.mrb[0].mxu0 }
  0xf3   : > { %v286_v8 = vadd.f32 %v285_v7, %v206_v6  ;;  %v287_v9 = vpop.f32.mrb[1].mxu0 }
  0xf4   : > { %v288_v10 = vadd.f32 %v287_v9, %v206_v6 }
  0xf5   : > { %v292_v11 = vmul.f32 0.70710677, %v286_v8  ;;  %v290_v15 = vmul.f32 0.5, %v286_v8 }
  0xf6   : > { %v293_v12 = vmul.f32 0.70710677, %v288_v10  ;;  %v291_v17 = vmul.f32 0.5, %v288_v10 }
  0xf7   : > { %472 = verf.f32 %v292_v11 }
  0xf8   : > { %474 = verf.f32 %v293_v12 }
 0x101   : > { %v473_v13 = vpop.eup %472 }
 0x102   : > { %v475_v14 = vpop.eup %474  ;;  %v296_v16 = vadd.f32 1.0, %v473_v13 }
 0x103   : > { %v297_v18 = vadd.f32 1.0, %v475_v14 }
 0x104   : > { %v298_v19 = vmul.f32 %v296_v16, %v290_v15 }
 0x105   : > { %v299_v20 = vmul.f32 %v297_v18, %v291_v17 }
 0x106   : > { %300 = vst [vmem:[%s188_s11] sm:$0xff] %v298_v19 }
 0x107   : > { %301 = vst [vmem:[%s188_s11 + $0x8] sm:$0xff] %v299_v20 }
 0x108   : > { %489 = shalt.err (!%p486_p5)
}
 0x109   : > { %s490_s30 = scalar_lea.hbm %s650_s23, 256  ;;  %s494_s6 = scalar_lea.hbm %s700_s3, 512 }
 0x10a   : > { %p491_p6 = scmp.ne.s32.totalorder %s650_s23, %s490_s30  ;;  %p495_p10 = scmp.lt.u32.totalorder %s650_s23, %s700_s3 }
 0x10b   : > { %p496_p11 = scmp.lt.u32.totalorder %s494_s6, %s490_s30  ;;  %p498_p13 = scmp.lt.u32.totalorder %s490_s30, %s650_s23 }
 0x10c   : > { %p492_p7 = pnand %p491_p6, %p619_p4 }
 0x10d   : > { %p497_p12 = por %p496_p11, %p495_p10 }
 0x10e   : > { %p493_p9 = pneg %p492_p7 }
 0x10f   : > { %p499_p0 = por %p498_p13, %p497_p12 }
 0x111   : > { %p500_p1 = pnand %p499_p0, %p493_p9 }
 0x113   : > { %503 = shalt.err (!%p500_p1)
}
 0x114   : > { %413 = dma.vmem_to_hbm [thread:$0]  (%p619_p4), %s652_s18, 256, %s650_s23, %s303_s26  }
 0x115 PF: > { %p419_p2 = scmp.ge.s32.totalorder %s554_s17, 2  ;;  %s331_s9 = sand.u32 1, %s534_s12  }
 0x116   : > { %s332_s10 = scalar_lea.sflag [#allocation3], %s331_s9 }
 0x117   : > { %p416_p3 = pnand %p419_p2, %p626_p8 }
 0x119   : > { %529 = dma.done.wait (!%p416_p3), %s332_s10, 256  }
 0x11a   : > { %531 = vsyncadd (!%p416_p3), %s332_s10, 4294967040  ;;  %s16_s17 = sadd.s32 1, %s554_s17   ;;  %s703_s12 = smov %s538_s13 }
 0x11b   : > { %p13_p5 = scmp.ge.s32.totalorder %s16_s17, 4   ;;  %s704_s13 = smov %s542_s14 }
 0x11c   : > { %s705_s14 = smov %s632_s25  ;;  %s706_s15 = smov %s550_s16 }
 0x11d   : > { %s707_s16 = smov %s709_s20  ;;  %15 = sbr.rel (!%p13_p5) target bundleno = 4 (0x4), region = 67 }
 0x124   :  { %337 = vsyncpa [#allocation3], 1 }
 0x125   :  { %339 = vsyncpa [#allocation3 + $0x1], 1 }

</bundles_post_ra>
